<compile_context>
chip_gen: v5e
topology: v5e:2x2
jax: 0.10.0
libtpu: 0.0.40
codegen_flags: <defaults>
</compile_context>

<pallas_src>
import functools
import math

import jax
import jax.numpy as jnp
from jax.experimental import pallas as pl
from jax.experimental.pallas import tpu as pltpu


def _xlogx(p):
    """p*log(p) with the 0*log(0) := 0 convention (trace-time Python float)."""
    return 0.0 if p <= 0.0 else float(p) * math.log(p)


def _round_up(a, b):
    return (a + b - 1) // b * b


def _sublane_multiple(itemsize):
    # Native sublane packing: f32 -> 8, bf16 -> 16, int8/fp8 -> 32.
    return {4: 8, 2: 16, 1: 32}.get(itemsize, 8)


def _pick_vmem_limit():
    """Scoped-VMEM budget: generous, but safe on v7x's 64 MiB per TensorCore."""
    try:
        cap = pltpu.get_tpu_info().vmem_capacity_bytes
    except Exception:  # not queryable -> assume the smallest current generation
        cap = 64 * 1024 * 1024
    return int(min(cap * 0.65, 100 * 1024 * 1024))


def _auto_tiles(n, v, itemsize, vmem_limit, sub):
    """Pick (tile_n, tile_v) so one x block is as large as safely fits VMEM."""
    n_sub = _round_up(max(n, 1), sub)
    v128 = _round_up(v, 128)

    # VMEM working-set model per x block of B input bytes:
    #   2*B (double-buffered input) + ~4 full-tile f32 elementwise temps
    # (the compare/select/multiply chain is accumulated in f32).
    denom = 2.0 + 4.0 * (4.0 / itemsize)
    block_budget = int(vmem_limit / denom)
    block_budget = min(block_budget, 16 * 1024 * 1024)   # diminishing returns
    block_budget = max(block_budget, sub * 128 * itemsize)
    max_elems = block_budget // itemsize

    if v128 * sub <= max_elems:
        tv = v128                      # whole vocab per step -> 1-D grid over N
    else:
        tv = min(v128, max(128, (max_elems // 256) // 128 * 128))
    tn = min(n_sub, max(sub, (max_elems // tv) // sub * sub))

    # Guarantee >= 2 blocks on the parallel N axis whenever possible so both
    # TensorCores on v7x get work (negligible extra step cost on v5e/v6e).
    if _round_up(n, tn) // tn < 2 and n_sub >= 2 * sub:
        tn = _round_up(-(-n_sub // 2), sub)
    return tn, tv


def _label_smoothing_kernel(x_ref, tgt_ref, o_ref, acc_ref, *,
                            base, confidence, const_k, padding_idx):
    j = pl.program_id(1)                       # V (reduction) grid index
    tn, tv = x_ref.shape

    @pl.when(j == 0)
    def _init():
        acc_ref[...] = jnp.zeros_like(acc_ref)

    tgt = tgt_ref[...]                         # (tn, 1) int32 global labels
    tgt_local = tgt - j * tv                   # shift target, not the iota
    col = jax.lax.broadcasted_iota(jnp.int32, (tn, tv), 1)

    # Fused coefficient reduction: coeff = -conf at the target column, -base
    # elsewhere; one select + multiply + lane-reduce per element, f32 accum.
    coeff = jnp.where(col == tgt_local, -confidence, -base)
    acc_ref[...] += jnp.sum(coeff * x_ref[...].astype(jnp.float32),
                            axis=1, keepdims=True)

    # The padding column contributes nothing to the loss; add back the
    # base * x[:, padding_idx] that the reduction over-subtracted.  padding_idx
    # is a static Python int, so only the V tile containing it pays (static
    # 1-lane slice, no full-width compare/select pass).
    if base != 0.0:
        pad_tile, pad_local = divmod(padding_idx, tv)

        @pl.when(j == pad_tile)
        def _pad_col():
            acc_ref[...] += base * x_ref[:, pad_local:pad_local + 1].astype(
                jnp.float32)

    @pl.when(j == pl.num_programs(1) - 1)
    def _finalize():
        keep = (tgt != padding_idx).astype(jnp.float32)   # zero padding rows
        per_row = keep * (acc_ref[...] + const_k)         # (tn, 1)
        tile_sum = jnp.sum(per_row)                       # scalar per N tile
        r = jax.lax.broadcasted_iota(jnp.int32, o_ref.shape, 0)
        c = jax.lax.broadcasted_iota(jnp.int32, o_ref.shape, 1)
        o_ref[...] = jnp.where((r == 0) & (c == 0), tile_sum, 0.0)


def label_smoothing_loss(x, target, *, size, padding_idx, smoothing=0.0,
                         tile_n=None, tile_v=None):
    """Pallas equivalent of LabelSmoothing(size, padding_idx, smoothing)(x, target).

    x: (N, V) log-probabilities (f32 or bf16, streamed in native dtype).
    target: (N,) integer class indices.
    tile_n / tile_v: optional overrides; by default sized from VMEM capacity.
    """
    n, v = x.shape
    assert v == size, "x.shape[1] must equal size"
    assert size > 2, "size must be > 2 (base divides by size - 2)"
    assert 0 <= padding_idx < size

    confidence = 1.0 - smoothing
    base = smoothing / (size - 2)
    # Constant per non-padding row, computed at trace time (no in-kernel logs).
    const_k = _xlogx(confidence) + (size - 2) * _xlogx(base)

    itemsize = jnp.dtype(x.dtype).itemsize
    sub = _sublane_multiple(itemsize)
    vmem_limit = _pick_vmem_limit()

    auto_tn, auto_tv = _auto_tiles(n, v, itemsize, vmem_limit, sub)
    tn = auto_tn if tile_n is None else min(_round_up(tile_n, sub),
                                            _round_up(n, sub))
    tv = auto_tv if tile_v is None else min(_round_up(tile_v, 128),
                                            _round_up(v, 128))

    n_pad = _round_up(n, tn)
    v_pad = _round_up(v, tv)

    xp = x
    if (n_pad, v_pad) != (n, v):
        # Zero-padded entries contribute coeff*0 = 0; padded rows also carry
        # target == padding_idx and are masked out entirely.
        xp = jnp.pad(x, ((0, n_pad - n), (0, v_pad - v)))
    tgt2d = target.reshape(n, 1).astype(jnp.int32)
    if n_pad != n:
        tgt2d = jnp.pad(tgt2d, ((0, n_pad - n), (0, 0)),
                        constant_values=padding_idx)

    grid_n = n_pad // tn
    grid_v = v_pad // tv

    kernel = functools.partial(
        _label_smoothing_kernel,
        base=base, confidence=confidence, const_k=const_k,
        padding_idx=padding_idx)

    cost = pl.CostEstimate(
        flops=4 * n_pad * v_pad,
        transcendentals=0,
        bytes_accessed=n_pad * v_pad * itemsize + n_pad * 4 + grid_n * 8 * 128 * 4)

    out = pl.pallas_call(
        kernel,
        out_shape=jax.ShapeDtypeStruct((grid_n * 8, 128), jnp.float32),
        grid_spec=pltpu.PrefetchScalarGridSpec(
            num_scalar_prefetch=0,
            grid=(grid_n, grid_v),
            in_specs=[
                pl.BlockSpec((tn, tv), lambda i, j: (i, j)),   # x tile
                pl.BlockSpec((tn, 1), lambda i, j: (i, 0)),    # targets per N tile
            ],
            out_specs=pl.BlockSpec((8, 128), lambda i, j: (i, 0)),
            scratch_shapes=[pltpu.VMEM((tn, 1), jnp.float32)],
        ),
        compiler_params=pltpu.CompilerParams(
            dimension_semantics=("parallel", "arbitrary"),
            vmem_limit_bytes=vmem_limit),
        cost_estimate=cost,
    )(xp, tgt2d)

    # Each N tile wrote one scalar partial (at [0, 0] of its (8, 128) output
    # block, zeros elsewhere): summing the tiny output finishes the reduction.
    return jnp.sum(out)


def _reference_loss(x, target, *, size, padding_idx, smoothing):
    """Pure-JAX reference mirroring the PyTorch module."""
    x = x.astype(jnp.float32)
    n, v = x.shape
    confidence = 1.0 - smoothing
    base = smoothing / (size - 2)
    col = jnp.arange(v)[None, :]
    tgt = target[:, None]
    td = jnp.where(col == tgt, confidence, base).astype(jnp.float32)
    td = jnp.where(col == padding_idx, 0.0, td)
    td = jnp.where(tgt == padding_idx, 0.0, td)
    safe_log = jnp.log(jnp.where(td > 0, td, 1.0))
    return jnp.sum(jnp.where(td > 0, td * (safe_log - x), 0.0))


if __name__ == "__main__":
    # TODO(synk): the PyTorch module also stashes `self.true_dist` as a side
    # effect; only the returned loss is reproduced here.
    key = jax.random.PRNGKey(0)

    # --- Test 1: small shapes consistent with the module (N=8 tokens, V=32),
    #             auto tiling (single block, 1x1 grid). ---
    SIZE, PADDING_IDX, SMOOTHING, N = 32, 0, 0.1, 8
    k_logits, k_tgt, key = jax.random.split(key, 3)
    logits = jax.random.normal(k_logits, (N, SIZE), dtype=jnp.float32)
    x = jax.nn.log_softmax(logits, axis=-1)            # KLDivLoss expects log-probs
    target = jax.random.randint(k_tgt, (N,), 0, SIZE, dtype=jnp.int32)
    target = target.at[1].set(PADDING_IDX).at[5].set(PADDING_IDX)

    loss = jax.block_until_ready(label_smoothing_loss(
        x, target, size=SIZE, padding_idx=PADDING_IDX, smoothing=SMOOTHING))
    ref = _reference_loss(x, target, size=SIZE, padding_idx=PADDING_IDX,
                          smoothing=SMOOTHING)
    assert jnp.allclose(loss, ref, rtol=1e-4, atol=1e-3), (loss, ref)

    # --- Test 2: exercises the tiled grid (4x2), bf16 input (tile_n aligned to
    #             16 for bf16 packing), pad column in the second V tile. ---
    SIZE2, PADDING_IDX2, SMOOTHING2, N2 = 256, 130, 0.2, 64
    k_logits2, k_tgt2, key = jax.random.split(key, 3)
    logits2 = jax.random.normal(k_logits2, (N2, SIZE2), dtype=jnp.float32)
    x2 = jax.nn.log_softmax(logits2, axis=-1).astype(jnp.bfloat16)
    target2 = jax.random.randint(k_tgt2, (N2,), 0, SIZE2, dtype=jnp.int32)
    target2 = target2.at[0].set(PADDING_IDX2).at[7].set(PADDING_IDX2)

    loss2 = jax.block_until_ready(label_smoothing_loss(
        x2, target2, size=SIZE2, padding_idx=PADDING_IDX2, smoothing=SMOOTHING2,
        tile_n=16, tile_v=128))
    ref2 = _reference_loss(x2, target2, size=SIZE2, padding_idx=PADDING_IDX2,
                           smoothing=SMOOTHING2)
    assert jnp.allclose(loss2, ref2, rtol=1e-4, atol=1e-3), (loss2, ref2)

    # --- Test 3: auto tiling with row+column padding and a forced >=2-block
    #             split on the parallel N axis. ---
    SIZE3, PADDING_IDX3, SMOOTHING3, N3 = 300, 5, 0.15, 40
    k_logits3, k_tgt3, key = jax.random.split(key, 3)
    logits3 = jax.random.normal(k_logits3, (N3, SIZE3), dtype=jnp.float32)
    x3 = jax.nn.log_softmax(logits3, axis=-1)
    target3 = jax.random.randint(k_tgt3, (N3,), 0, SIZE3, dtype=jnp.int32)
    target3 = target3.at[3].set(PADDING_IDX3).at[11].set(PADDING_IDX3)

    loss3 = jax.block_until_ready(label_smoothing_loss(
        x3, target3, size=SIZE3, padding_idx=PADDING_IDX3, smoothing=SMOOTHING3))
    ref3 = _reference_loss(x3, target3, size=SIZE3, padding_idx=PADDING_IDX3,
                           smoothing=SMOOTHING3)
    assert jnp.allclose(loss3, ref3, rtol=1e-4, atol=1e-3), (loss3, ref3)

    print("KERNEL_OK")
</pallas_src>

<mosaic_0001>
module attributes {stable_mosaic.version = 11 : i64} {
  func.func @_label_smoothing_kernel(%arg0: i32, %arg1: i32, %arg2: memref<8x128xf32, #tpu.memory_space<vmem>>, %arg3: memref<8x1xi32, #tpu.memory_space<vmem>>, %arg4: memref<8x128xf32, #tpu.memory_space<vmem>>, %arg5: memref<8x1xf32, #tpu.memory_space<vmem>>) attributes {dimension_semantics = [#tpu.dimension_semantics<parallel>, #tpu.dimension_semantics<arbitrary>], iteration_bounds = array<i64: 1, 1>, scalar_prefetch = 0 : i64, scratch_operands = 1 : i64, tpu.core_type = #tpu.core_type<tc>, window_params = [{transform_indices = @transform_0, window_bounds = array<i64: 8, 128>}, {transform_indices = @transform_1, window_bounds = array<i64: 8, 1>}, {transform_indices = @transform_2, window_bounds = array<i64: 8, 128>}]} {
    %c0_i32 = arith.constant 0 : i32
    %0 = arith.cmpi eq, %arg1, %c0_i32 : i32
    %1 = arith.extui %0 : i1 to i32
    %c0_i32_0 = arith.constant 0 : i32
    %2 = arith.cmpi ne, %1, %c0_i32_0 : i32
    scf.if %2 {
      %cst_14 = arith.constant 0.000000e+00 : f32
      %26 = vector.broadcast %cst_14 : f32 to vector<8x1xf32>
      %c0_15 = arith.constant 0 : index
      %c0_16 = arith.constant 0 : index
      %27 = vector.load %arg5[%c0_15, %c0_16] : memref<8x1xf32, #tpu.memory_space<vmem>>, vector<8x1xf32>
      tpu.vector_store %arg5[%c0_15, %c0_16], %26 {strides = array<i32>} : memref<8x1xf32, #tpu.memory_space<vmem>>, vector<8x1xf32>,
    } else {
    }
    %c0 = arith.constant 0 : index
    %c0_1 = arith.constant 0 : index
    %3 = vector.load %arg3[%c0, %c0_1] : memref<8x1xi32, #tpu.memory_space<vmem>>, vector<8x1xi32>
    %c128_i32 = arith.constant 128 : i32
    %4 = arith.muli %arg1, %c128_i32 : i32
    %5 = vector.broadcast %4 : i32 to vector<8x1xi32>
    %6 = arith.subi %3, %5 : vector<8x1xi32>
    %7 = tpu.iota {dimensions = array<i32: 1>} : vector<8x128xi32>
    %8 = vector.broadcast %6 : vector<8x1xi32> to vector<8x128xi32>
    %9 = arith.cmpi eq, %7, %8 : vector<8x128xi32>
    %cst = arith.constant -0.899999976 : f32
    %cst_2 = arith.constant -0.00333333341 : f32
    %10 = vector.broadcast %cst : f32 to vector<8x128xf32>
    %11 = vector.broadcast %cst_2 : f32 to vector<8x128xf32>
    %12 = arith.select %9, %10, %11 : vector<8x128xi1>, vector<8x128xf32>
    %c0_3 = arith.constant 0 : index
    %c0_4 = arith.constant 0 : index
    %13 = vector.load %arg5[%c0_3, %c0_4] : memref<8x1xf32, #tpu.memory_space<vmem>>, vector<8x1xf32>
    %c0_5 = arith.constant 0 : index
    %c0_6 = arith.constant 0 : index
    %14 = vector.load %arg2[%c0_5, %c0_6] : memref<8x128xf32, #tpu.memory_space<vmem>>, vector<8x128xf32>
    %15 = arith.mulf %12, %14 : vector<8x128xf32>
    %cst_7 = arith.constant dense<0.000000e+00> : vector<8xf32>
    %16 = vector.multi_reduction <add>, %15, %cst_7 [1] : vector<8x128xf32> to vector<8xf32>
    %17 = vector.shape_cast %16 : vector<8xf32> to vector<8x1xf32>
    %18 = arith.addf %13, %17 : vector<8x1xf32>
    %c0_8 = arith.constant 0 : index
    %c0_9 = arith.constant 0 : index
    %19 = vector.load %arg5[%c0_8, %c0_9] : memref<8x1xf32, #tpu.memory_space<vmem>>, vector<8x1xf32>
    tpu.vector_store %arg5[%c0_8, %c0_9], %18 {strides = array<i32>} : memref<8x1xf32, #tpu.memory_space<vmem>>, vector<8x1xf32>,
    %c0_i32_10 = arith.constant 0 : i32
    %20 = arith.cmpi eq, %arg1, %c0_i32_10 : i32
    %21 = arith.extui %20 : i1 to i32
    %c0_i32_11 = arith.constant 0 : i32
    %22 = arith.cmpi ne, %21, %c0_i32_11 : i32
    scf.if %22 {
      %c0_14 = arith.constant 0 : index
      %c0_15 = arith.constant 0 : index
      %26 = vector.load %arg5[%c0_14, %c0_15] : memref<8x1xf32, #tpu.memory_space<vmem>>, vector<8x1xf32>
      %c0_16 = arith.constant 0 : index
      %c0_17 = arith.constant 0 : index
      %27 = vector.load %arg2[%c0_16, %c0_17] : memref<8x128xf32, #tpu.memory_space<vmem>>, vector<8x1xf32>
      %cst_18 = arith.constant 0.00333333341 : f32
      %28 = vector.broadcast %cst_18 : f32 to vector<8x1xf32>
      %29 = arith.mulf %28, %27 : vector<8x1xf32>
      %30 = arith.addf %26, %29 : vector<8x1xf32>
      %c0_19 = arith.constant 0 : index
      %c0_20 = arith.constant 0 : index
      %31 = vector.load %arg5[%c0_19, %c0_20] : memref<8x1xf32, #tpu.memory_space<vmem>>, vector<8x1xf32>
      tpu.vector_store %arg5[%c0_19, %c0_20], %30 {strides = array<i32>} : memref<8x1xf32, #tpu.memory_space<vmem>>, vector<8x1xf32>,
    } else {
    }
    %c0_i32_12 = arith.constant 0 : i32
    %23 = arith.cmpi eq, %arg1, %c0_i32_12 : i32
    %24 = arith.extui %23 : i1 to i32
    %c0_i32_13 = arith.constant 0 : i32
    %25 = arith.cmpi ne, %24, %c0_i32_13 : i32
    scf.if %25 {
      %c0_i32_14 = arith.constant 0 : i32
      %26 = vector.broadcast %c0_i32_14 : i32 to vector<8x1xi32>
      %27 = arith.cmpi ne, %3, %26 : vector<8x1xi32>
      %28 = arith.extui %27 : vector<8x1xi1> to vector<8x1xi32>
      %29 = arith.sitofp %28 : vector<8x1xi32> to vector<8x1xf32>
      %c0_15 = arith.constant 0 : index
      %c0_16 = arith.constant 0 : index
      %30 = vector.load %arg5[%c0_15, %c0_16] : memref<8x1xf32, #tpu.memory_space<vmem>>, vector<8x1xf32>
      %cst_17 = arith.constant -0.665202737 : f32
      %31 = vector.broadcast %cst_17 : f32 to vector<8x1xf32>
      %32 = arith.addf %30, %31 : vector<8x1xf32>
      %33 = arith.mulf %29, %32 : vector<8x1xf32>
      %34 = vector.shape_cast %33 : vector<8x1xf32> to vector<1x8x1xf32>
      %cst_18 = arith.constant dense<0.000000e+00> : vector<1xf32>
      %35 = vector.multi_reduction <add>, %34, %cst_18 [1, 2] : vector<1x8x1xf32> to vector<1xf32>
      %36 = vector.shape_cast %35 : vector<1xf32> to vector<1x1x1xf32>
      %37 = vector.extract %36[0, 0, 0] : f32 from vector<1x1x1xf32>
      %38 = tpu.iota {dimensions = array<i32: 0>} : vector<8x128xi32>
      %39 = tpu.iota {dimensions = array<i32: 1>} : vector<8x128xi32>
      %c0_i32_19 = arith.constant 0 : i32
      %40 = vector.broadcast %c0_i32_19 : i32 to vector<8x128xi32>
      %41 = arith.cmpi eq, %38, %40 : vector<8x128xi32>
      %c0_i32_20 = arith.constant 0 : i32
      %42 = vector.broadcast %c0_i32_20 : i32 to vector<8x128xi32>
      %43 = arith.cmpi eq, %39, %42 : vector<8x128xi32>
      %44 = arith.andi %41, %43 : vector<8x128xi1>
      %cst_21 = arith.constant 0.000000e+00 : f32
      %45 = vector.broadcast %37 : f32 to vector<8x128xf32>
      %46 = vector.broadcast %cst_21 : f32 to vector<8x128xf32>
      %47 = arith.select %44, %45, %46 : vector<8x128xi1>, vector<8x128xf32>
      %c0_22 = arith.constant 0 : index
      %c0_23 = arith.constant 0 : index
      %48 = vector.load %arg4[%c0_22, %c0_23] : memref<8x128xf32, #tpu.memory_space<vmem>>, vector<8x128xf32>
      tpu.vector_store %arg4[%c0_22, %c0_23], %47 {strides = array<i32>} : memref<8x128xf32, #tpu.memory_space<vmem>>, vector<8x128xf32>,
    } else {
    }
    return
  }
  func.func @transform_0(%arg0: i32, %arg1: i32) -> (i32, i32) {
    %c0_i32 = arith.constant 0 : i32
    return %arg0, %arg1 : i32, i32
  }
  func.func @transform_1(%arg0: i32, %arg1: i32) -> (i32, i32) {
    %c0_i32 = arith.constant 0 : i32
    %c0_i32_0 = arith.constant 0 : i32
    return %arg0, %c0_i32 : i32, i32
  }
  func.func @transform_2(%arg0: i32, %arg1: i32) -> (i32, i32) {
    %c0_i32 = arith.constant 0 : i32
    %c0_i32_0 = arith.constant 0 : i32
    return %arg0, %c0_i32 : i32, i32
  }
}

</mosaic_0001>

<bundles_post_ra>
// kernel: tpu_custom_call.1
= control target key start
LH: loop header
LB: loop body
LE: loop exit
PB: predicated region body
PF: predicated region fallthrough
CT: control target
= control target key end

     0   :  { %v119_v1 = vmov 0   ;;  %s151_s0 = inlined_call_operand.vmem [shape: f32[8,128], index: 0, kind: input, shape index: {}]   ;;  %s152_s1 = inlined_call_operand.vmem [shape: s32[8,1], index: 1, kind: input, shape index: {}]   ;;  %s153_s2 = inlined_call_operand.hbm [shape: f32[8,128], index: 2, kind: output, shape index: {}]  }
   0x1   :  { %v18_v0 = vld [vmem:[%s152_s1] sm:$0xff]  ;;  %92 = vset.pattern.permute.xlu0 %v119_v1 }
   0x2   :  { %7 = vsyncpa [#allocation4], 0  ;;  %25 = vperm.xlu0 %92, %v18_v0   ;;  %v22_v2 = vlaneseq  ;;  %v30_v5 = vld [vmem:[%s151_s0] sm:$0xff]  ;;  %v120_v6 = vmov -0.0033333334   ;;  %vm16_vm1 = vcmask 7168  }
   0x3   :  { %v121_v9 = vmov 0.0   ;;  %v42_v13 = vmul.f32 0.0033333334, %v30_v5  ;;  %vm45_vm2 = vcmp.ne.s32.totalorder %v18_v0, 0  ;;  %s122_s0 = smov [#allocation3]   ;;  %s76_s15 = sshll.u32 %s153_s2, 4  ;;  %s77_s15 = int_to_ptr.hbm [resolvable:$true] %s76_s15 }
   0x4   :  { %v23_v3 = vand.u32 127, %v22_v2  ;;  %17 = vst.msk [vmem:[#allocation2] sm:$0xff] %vm16_vm1, %v121_v9  ;;  %v85_v16 = vsel %vm45_vm2, 1.0, %v121_v9  ;;  %v62_v28 = vshrl.u32 %v22_v2, 7  ;;  %s74_s1 = sshll.u32 %s122_s0, 4  ;;  %s75_s1 = int_to_ptr.vmem [resolvable:$true] %s74_s1 }
   0x6   :  { %vm63_vm3 = vcmp.eq.s32.totalorder %v62_v28, 0  ;;  %vm64_vm4 = vcmp.eq.s32.totalorder %v23_v3, 0 }
   0x7   :  { %vm65_vm5 = vmand %vm63_vm3, %vm64_vm4 }
   0xb   :  { %v29_v10 = vld [vmem:[#allocation2] sm:$0xff] }
  0x74   :  { %v26_v4 = vpop.permute.xlu0 %25 }
  0x75   :  { %vm27_vm0 = vcmp.eq.s32.totalorder %v23_v3, %v26_v4 }
  0x76   :  { %v28_v7 = vsel %vm27_vm0, -0.9, %v120_v6 }
  0x77   :  { %v31_v8 = vmul.f32 %v30_v5, %v28_v7 }
  0x79   :  { %32 = vadd.xlane.f32.xlu0 %v31_v8 }
  0xec   :  { %v33_v11 = vpop.xlane.xlu0 %32 }
  0xed   :  { %v34_v12 = vadd.f32 %v33_v11, %v29_v10 }
  0xef   :  { %36 = vst.msk [vmem:[#allocation2] sm:$0xff] %vm16_vm1, %v34_v12 }
  0xf6   :  { %v40_v14 = vld [vmem:[#allocation2] sm:$0xff] }
  0xf7   :  { %v43_v15 = vadd.f32 %v42_v13, %v40_v14 }
  0xf9   :  { %44 = vst.msk [vmem:[#allocation2] sm:$0xff] %vm16_vm1, %v43_v15 }
 0x100   :  { %v48_v17 = vld [vmem:[#allocation2] sm:$0xff] }
 0x101   :  { %v49_v18 = vadd.f32 -0.66520274, %v48_v17 }
 0x103   :  { %v50_v19 = vmul.f32 %v85_v16, %v49_v18 }
 0x105   :  { %v51_v20 = vsel %vm16_vm1, %v50_v19, 0.0 }
 0x106   :  { %52 = vadd.xlane.f32.xlu1 %v51_v20 }
 0x179   :  { %v53_v21 = vpop.xlane.xlu1 %52 }
 0x17a   :  { %v54_v22 = vrot.slane %v53_v21, 4 }
 0x17c   :  { %v55_v23 = vadd.f32 %v54_v22, %v53_v21 }
 0x17e   :  { %v56_v24 = vrot.slane %v55_v23, 2 }
 0x180   :  { %v57_v25 = vadd.f32 %v56_v24, %v55_v23 }
 0x182   :  { %v58_v26 = vrot.slane %v57_v25, 1 }
 0x184   :  { %v59_v27 = vadd.f32 %v58_v26, %v57_v25 }
 0x186   :  { %86 = vpush %v59_v27 }
 0x1b7   :  { %s87_s16 = spop %86 }
 0x1b8   :  { %v66_v29 = vstv %s87_s16 }
 0x1b9   :  { %v67_v30 = vsel %vm65_vm5, %v66_v29, 0.0 }
 0x1ba   :  { %68 = vst [vmem:[#allocation3] sm:$0xff] %v67_v30 }
 0x1bb   :  { %79 = dma.vmem_to_hbm [thread:$0]  %s75_s1, 128, %s77_s15, [#allocation4]  }
 0x1bc   :  { %117 = dma.done.wait [#allocation4], 128  }
 0x1bd   :  { %118 = vsyncadd [#allocation4], 4294967168 }
 0x1be   :  { %84 = vsyncpa [#allocation4], 1 }

</bundles_post_ra>
